<compile_context>
chip_gen: v7x
topology: tpu7x:2x2x1
jax: 0.10.0
libtpu: 0.0.40
codegen_flags: <defaults>
</compile_context>

<pallas_src>
import jax
import jax.numpy as jnp
from jax.experimental import pallas as pl
from jax.experimental.pallas import tpu as pltpu


def _make_sobel_kernel(W: int):
    """Kernel over a (TB, TC, L) tile of lane-flattened (H*W) image planes."""

    def kernel(edge_ref, x_ref, out_ref):
        x = x_ref[...]                      # (TB, TC, L)
        L = x.shape[-1]
        lead = x.shape[:-1]

        def shift(a, o):
            # b[..., i] = a[..., i + o], zero where i + o is outside [0, L).
            w = abs(o)
            z = jnp.zeros(lead + (w,), a.dtype)
            if o > 0:
                return jnp.concatenate([a[..., o:], z], axis=-1)
            return jnp.concatenate([z, a[..., :L - w]], axis=-1)

        # Column-edge masks (tiny constant input, resident in VMEM):
        # nf zeros flattened positions whose column == 0,
        # nl zeros positions whose column == W-1.
        nf = edge_ref[0:1, :]               # (1, L) -> broadcasts over (TB, TC, L)
        nl = edge_ref[1:2, :]

        # Row neighbours; rows outside the image are the zeros from shift().
        up = shift(x, -W)                   # X(y-1, x)
        down = shift(x, W)                  # X(y+1, x)

        d = down - up                       # vertical difference
        s = up + 2.0 * x + down             # vertical smoothing

        # Column neighbours with zero padding at the left/right image edges.
        dm1 = shift(d, -1) * nf             # d(y, x-1)
        dp1 = shift(d, 1) * nl              # d(y, x+1)
        sm1 = shift(s, -1) * nf             # s(y, x-1)
        sp1 = shift(s, 1) * nl              # s(y, x+1)

        # kernel_v = [[-1,-2,-1],[0,0,0],[1,2,1]]
        # kernel_h = [[-1,0,1],[-2,0,2],[-1,0,1]]   (F.conv2d = cross-correlation)
        v = dm1 + 2.0 * d + dp1
        h = sp1 - sm1
        mag = jnp.sqrt(v * v + h * h + 1e-6)

        out_ref[:, 0, :, :] = mag
        out_ref[:, 1, :, :] = h
        out_ref[:, 2, :, :] = v

    return kernel


def _pick_tiles(B, C, L, itemsize, tile_budget_bytes=36 * 1024 * 1024):
    """Choose (TB, TC) so double-buffered tiles + body temporaries fit VMEM.

    Rough per-(batch, channel)-plane footprint: 2x input (double buffer)
    + 6x output (3 planes, double buffered) + ~10 live intermediates ≈ 18
    planes.  Budget is conservative enough for v7x's 64 MiB physical VMEM.
    """
    per_unit = 18 * L * itemsize
    cap_c = max(1, tile_budget_bytes // per_unit)
    if C <= cap_c:
        tc = C
    else:
        # Prefer a multiple-of-8 divisor so the second-minor block dim respects
        # the (8, 128) tiling rule; otherwise any divisor of C is still legal
        # (just with some sublane padding).
        div8 = [d for d in range(8, cap_c + 1, 8) if C % d == 0]
        tc = max(div8) if div8 else max(
            d for d in range(1, cap_c + 1) if C % d == 0)
    cap_b = max(1, tile_budget_bytes // (per_unit * tc))
    tb = max(d for d in range(1, min(B, cap_b) + 1) if B % d == 0)
    # Keep at least 2 grid steps when possible so both TensorCores on v7x
    # (2 TCs/chip) get work; near-neutral on v5e/v6e (single TC).
    if tb == B and tc == C and B > 1:
        tb = max(d for d in range(1, B) if B % d == 0)
    return tb, tc


def grad_info(x):
    """x: (B, C, H, W) -> (B, 3*C, H, W) = concat([|grad|, grad_h, grad_v], dim=1)."""
    B, C, H, W = x.shape
    L = H * W
    itemsize = jnp.dtype(x.dtype).itemsize

    # Free (adjacent-dim) reshape: lane-dense last dim of size H*W.
    xf = x.reshape(B, C, L)

    # Column-edge masks: edge[0, i] = 0 where (i % W) == 0,
    #                    edge[1, i] = 0 where (i % W) == W-1, else 1.
    col = jnp.arange(L, dtype=jnp.int32) % W
    edge = jnp.stack([(col != 0), (col != (W - 1))]).astype(x.dtype)  # (2, L)

    TB, TC = _pick_tiles(B, C, L, itemsize)

    out = pl.pallas_call(
        _make_sobel_kernel(W),
        out_shape=jax.ShapeDtypeStruct((B, 3, C, L), x.dtype),
        grid_spec=pltpu.PrefetchScalarGridSpec(
            num_scalar_prefetch=0,
            grid=(B // TB, C // TC),
            in_specs=[
                pl.BlockSpec((2, L), lambda bi, ci: (0, 0)),            # edge masks
                pl.BlockSpec((TB, TC, L), lambda bi, ci: (bi, ci, 0)),  # input planes
            ],
            out_specs=pl.BlockSpec((TB, 3, TC, L),
                                   lambda bi, ci: (bi, 0, ci, 0)),
        ),
        compiler_params=pltpu.CompilerParams(
            dimension_semantics=("parallel", "parallel"),
            vmem_limit_bytes=48 * 1024 * 1024,
        ),
    )(edge, xf)

    # (B, 3, C, H*W) -> (B, 3*C, H, W): merges/splits of adjacent dims only,
    # so this is a free reshape (no transpose, no concat, no extra HBM pass).
    return out.reshape(B, 3 * C, H, W)


if __name__ == "__main__":
    key = jax.random.PRNGKey(0)
    B, C, H, W = 2, 4, 16, 16
    x = jax.random.normal(key, (B, C, H, W), dtype=jnp.float32)

    out = grad_info(x)
    jax.block_until_ready(out)

    assert out.shape == (B, 3 * C, H, W), out.shape
    assert out.dtype == jnp.float32

    # Pure-JAX reference (same zero-padded Sobel cross-correlation as PyTorch).
    xp = jnp.pad(x, ((0, 0), (0, 0), (1, 1), (1, 1)))
    tap = lambda dy, dx: xp[:, :, dy:dy + H, dx:dx + W]
    v_ref = (-tap(0, 0) - 2 * tap(0, 1) - tap(0, 2)
             + tap(2, 0) + 2 * tap(2, 1) + tap(2, 2))
    h_ref = (-tap(0, 0) + tap(0, 2) - 2 * tap(1, 0) + 2 * tap(1, 2)
             - tap(2, 0) + tap(2, 2))
    mag_ref = jnp.sqrt(v_ref * v_ref + h_ref * h_ref + 1e-6)
    ref = jnp.concatenate([mag_ref, h_ref, v_ref], axis=1)
    assert jnp.allclose(out, ref, atol=1e-5), float(jnp.max(jnp.abs(out - ref)))

    print("KERNEL_OK")
</pallas_src>

<mosaic_0001>
module attributes {stable_mosaic.version = 11 : i64} {
  func.func @kernel(%arg0: i32, %arg1: i32, %arg2: memref<2x256xf32, #tpu.memory_space<vmem>>, %arg3: memref<1x4x256xf32, #tpu.memory_space<vmem>>, %arg4: memref<1x3x4x256xf32, #tpu.memory_space<vmem>>) attributes {dimension_semantics = [#tpu.dimension_semantics<parallel>, #tpu.dimension_semantics<parallel>], iteration_bounds = array<i64: 2, 1>, scalar_prefetch = 0 : i64, scratch_operands = 0 : i64, tpu.core_type = #tpu.core_type<tc>, window_params = [{pipeline_mode = #tpu.pipeline_mode<synchronous>, transform_indices = @transform_0, window_bounds = array<i64: 2, 256>}, {transform_indices = @transform_1, window_bounds = array<i64: 1, 4, 256>}, {transform_indices = @transform_2, window_bounds = array<i64: 1, 3, 4, 256>}]} {
    %c0 = arith.constant 0 : index
    %c0_0 = arith.constant 0 : index
    %c0_1 = arith.constant 0 : index
    %0 = vector.load %arg3[%c0, %c0_0, %c0_1] : memref<1x4x256xf32, #tpu.memory_space<vmem>>, vector<1x4x256xf32>
    %c0_2 = arith.constant 0 : index
    %c0_3 = arith.constant 0 : index
    %1 = vector.load %arg2[%c0_2, %c0_3] : memref<2x256xf32, #tpu.memory_space<vmem>>, vector<1x256xf32>
    %c1 = arith.constant 1 : index
    %c0_4 = arith.constant 0 : index
    %2 = vector.load %arg2[%c1, %c0_4] : memref<2x256xf32, #tpu.memory_space<vmem>>, vector<1x256xf32>
    %cst = arith.constant 0.000000e+00 : f32
    %3 = vector.broadcast %cst : f32 to vector<1x4x16xf32>
    %4 = vector.extract_strided_slice %0 {offsets = [0, 0, 0], sizes = [1, 4, 240], strides = [1, 1, 1]} : vector<1x4x256xf32> to vector<1x4x240xf32>
    %5 = tpu.concatenate %3, %4 in 2 : vector<1x4x16xf32>, vector<1x4x240xf32> -> vector<1x4x256xf32>
    %cst_5 = arith.constant 0.000000e+00 : f32
    %6 = vector.broadcast %cst_5 : f32 to vector<1x4x16xf32>
    %7 = vector.extract_strided_slice %0 {offsets = [0, 0, 16], sizes = [1, 4, 240], strides = [1, 1, 1]} : vector<1x4x256xf32> to vector<1x4x240xf32>
    %8 = tpu.concatenate %7, %6 in 2 : vector<1x4x240xf32>, vector<1x4x16xf32> -> vector<1x4x256xf32>
    %9 = arith.subf %8, %5 : vector<1x4x256xf32>
    %cst_6 = arith.constant 2.000000e+00 : f32
    %10 = vector.broadcast %cst_6 : f32 to vector<1x4x256xf32>
    %11 = arith.mulf %10, %0 : vector<1x4x256xf32>
    %12 = arith.addf %5, %11 : vector<1x4x256xf32>
    %13 = arith.addf %12, %8 : vector<1x4x256xf32>
    %cst_7 = arith.constant 0.000000e+00 : f32
    %14 = vector.broadcast %cst_7 : f32 to vector<1x4x1xf32>
    %15 = vector.extract_strided_slice %9 {offsets = [0, 0, 0], sizes = [1, 4, 255], strides = [1, 1, 1]} : vector<1x4x256xf32> to vector<1x4x255xf32>
    %16 = tpu.concatenate %14, %15 in 2 : vector<1x4x1xf32>, vector<1x4x255xf32> -> vector<1x4x256xf32>
    %17 = vector.shape_cast %1 : vector<1x256xf32> to vector<1x1x256xf32>
    %18 = vector.broadcast %17 : vector<1x1x256xf32> to vector<1x4x256xf32>
    %19 = arith.mulf %16, %18 : vector<1x4x256xf32>
    %cst_8 = arith.constant 0.000000e+00 : f32
    %20 = vector.broadcast %cst_8 : f32 to vector<1x4x1xf32>
    %21 = vector.extract_strided_slice %9 {offsets = [0, 0, 1], sizes = [1, 4, 255], strides = [1, 1, 1]} : vector<1x4x256xf32> to vector<1x4x255xf32>
    %22 = tpu.concatenate %21, %20 in 2 : vector<1x4x255xf32>, vector<1x4x1xf32> -> vector<1x4x256xf32>
    %23 = vector.shape_cast %2 : vector<1x256xf32> to vector<1x1x256xf32>
    %24 = vector.broadcast %23 : vector<1x1x256xf32> to vector<1x4x256xf32>
    %25 = arith.mulf %22, %24 : vector<1x4x256xf32>
    %cst_9 = arith.constant 0.000000e+00 : f32
    %26 = vector.broadcast %cst_9 : f32 to vector<1x4x1xf32>
    %27 = vector.extract_strided_slice %13 {offsets = [0, 0, 0], sizes = [1, 4, 255], strides = [1, 1, 1]} : vector<1x4x256xf32> to vector<1x4x255xf32>
    %28 = tpu.concatenate %26, %27 in 2 : vector<1x4x1xf32>, vector<1x4x255xf32> -> vector<1x4x256xf32>
    %29 = vector.shape_cast %1 : vector<1x256xf32> to vector<1x1x256xf32>
    %30 = vector.broadcast %29 : vector<1x1x256xf32> to vector<1x4x256xf32>
    %31 = arith.mulf %28, %30 : vector<1x4x256xf32>
    %cst_10 = arith.constant 0.000000e+00 : f32
    %32 = vector.broadcast %cst_10 : f32 to vector<1x4x1xf32>
    %33 = vector.extract_strided_slice %13 {offsets = [0, 0, 1], sizes = [1, 4, 255], strides = [1, 1, 1]} : vector<1x4x256xf32> to vector<1x4x255xf32>
    %34 = tpu.concatenate %33, %32 in 2 : vector<1x4x255xf32>, vector<1x4x1xf32> -> vector<1x4x256xf32>
    %35 = vector.shape_cast %2 : vector<1x256xf32> to vector<1x1x256xf32>
    %36 = vector.broadcast %35 : vector<1x1x256xf32> to vector<1x4x256xf32>
    %37 = arith.mulf %34, %36 : vector<1x4x256xf32>
    %cst_11 = arith.constant 2.000000e+00 : f32
    %38 = vector.broadcast %cst_11 : f32 to vector<1x4x256xf32>
    %39 = arith.mulf %38, %9 : vector<1x4x256xf32>
    %40 = arith.addf %19, %39 : vector<1x4x256xf32>
    %41 = arith.addf %40, %25 : vector<1x4x256xf32>
    %42 = arith.subf %37, %31 : vector<1x4x256xf32>
    %43 = arith.mulf %41, %41 : vector<1x4x256xf32>
    %44 = arith.mulf %42, %42 : vector<1x4x256xf32>
    %45 = arith.addf %43, %44 : vector<1x4x256xf32>
    %cst_12 = arith.constant 9.99999997E-7 : f32
    %46 = vector.broadcast %cst_12 : f32 to vector<1x4x256xf32>
    %47 = arith.addf %45, %46 : vector<1x4x256xf32>
    %48 = math.sqrt %47 : vector<1x4x256xf32>
    %c0_13 = arith.constant 0 : index
    %c0_14 = arith.constant 0 : index
    %c0_15 = arith.constant 0 : index
    %c0_16 = arith.constant 0 : index
    %49 = vector.load %arg4[%c0_13, %c0_14, %c0_15, %c0_16] : memref<1x3x4x256xf32, #tpu.memory_space<vmem>>, vector<1x1x4x256xf32>
    %50 = vector.shape_cast %49 : vector<1x1x4x256xf32> to vector<1x4x256xf32>
    %51 = vector.shape_cast %48 : vector<1x4x256xf32> to vector<1x1x4x256xf32>
    tpu.vector_store %arg4[%c0_13, %c0_14, %c0_15, %c0_16], %51 {strides = array<i32>} : memref<1x3x4x256xf32, #tpu.memory_space<vmem>>, vector<1x1x4x256xf32>,
    %c0_17 = arith.constant 0 : index
    %c1_18 = arith.constant 1 : index
    %c0_19 = arith.constant 0 : index
    %c0_20 = arith.constant 0 : index
    %52 = vector.load %arg4[%c0_17, %c1_18, %c0_19, %c0_20] : memref<1x3x4x256xf32, #tpu.memory_space<vmem>>, vector<1x1x4x256xf32>
    %53 = vector.shape_cast %52 : vector<1x1x4x256xf32> to vector<1x4x256xf32>
    %54 = vector.shape_cast %42 : vector<1x4x256xf32> to vector<1x1x4x256xf32>
    tpu.vector_store %arg4[%c0_17, %c1_18, %c0_19, %c0_20], %54 {strides = array<i32>} : memref<1x3x4x256xf32, #tpu.memory_space<vmem>>, vector<1x1x4x256xf32>,
    %c0_21 = arith.constant 0 : index
    %c2 = arith.constant 2 : index
    %c0_22 = arith.constant 0 : index
    %c0_23 = arith.constant 0 : index
    %55 = vector.load %arg4[%c0_21, %c2, %c0_22, %c0_23] : memref<1x3x4x256xf32, #tpu.memory_space<vmem>>, vector<1x1x4x256xf32>
    %56 = vector.shape_cast %55 : vector<1x1x4x256xf32> to vector<1x4x256xf32>
    %57 = vector.shape_cast %41 : vector<1x4x256xf32> to vector<1x1x4x256xf32>
    tpu.vector_store %arg4[%c0_21, %c2, %c0_22, %c0_23], %57 {strides = array<i32>} : memref<1x3x4x256xf32, #tpu.memory_space<vmem>>, vector<1x1x4x256xf32>,
    return
  }
  func.func @transform_0(%arg0: i32, %arg1: i32) -> (i32, i32) {
    %c0_i32 = arith.constant 0 : i32
    %c0_i32_0 = arith.constant 0 : i32
    %c0_i32_1 = arith.constant 0 : i32
    return %c0_i32, %c0_i32_0 : i32, i32
  }
  func.func @transform_1(%arg0: i32, %arg1: i32) -> (i32, i32, i32) {
    %c0_i32 = arith.constant 0 : i32
    %c0_i32_0 = arith.constant 0 : i32
    return %arg0, %arg1, %c0_i32 : i32, i32, i32
  }
  func.func @transform_2(%arg0: i32, %arg1: i32) -> (i32, i32, i32, i32) {
    %c0_i32 = arith.constant 0 : i32
    %c0_i32_0 = arith.constant 0 : i32
    %c0_i32_1 = arith.constant 0 : i32
    return %arg0, %c0_i32, %arg1, %c0_i32_0 : i32, i32, i32, i32
  }
}

</mosaic_0001>

<bundles_post_ra>
// kernel: tpu_custom_call.1
= control target key start
LH: loop header
LB: loop body
LE: loop exit
PB: predicated region body
PF: predicated region fallthrough
CT: control target
= control target key end

     0   :  { %7 = vsyncpa [#allocation3], 0  ;;  %s961_s0 = inlined_call_operand.hbm [shape: f32[2,256], index: 0, kind: input, shape index: {}]   ;;  %s962_s1 = inlined_call_operand.hbm [shape: f32[2,4,256], index: 1, kind: input, shape index: {}]   ;;  %s963_s2 = inlined_call_operand.hbm [shape: f32[2,3,4,256], index: 2, kind: output, shape index: {}]  }
   0x1   :  { %8 = vsyncpa [#allocation6], 0 }
   0x2   :  { %10 = vsyncpa [#allocation6 + $0x1], 0 }
   0x3   :  { %11 = vsyncpa [#allocation4], 0 }
   0x4   :  { %13 = vsyncpa [#allocation4 + $0x1], 0  ;;  %s728_s9 = smov 0   ;;  %s730_s10 = smov 0  }
   0x5   :  { %s732_s11 = smov 0   ;;  %s734_s12 = smov 0  }
   0x6   :  { %s736_s13 = smov 0   ;;  %s738_s14 = smov 0  }
   0x7 LB: > { %s455_s15 = sadd.s32 4294967295, %s702_s14   ;;  %s456_s16 = sadd.s32 4294967294, %s702_s14   ;;  %s702_s14 = sphi %s738_s14, %s19_s14   ;;  %s698_s13 = sphi %s736_s13, %s988_s13   ;;  %s694_s12 = sphi %s734_s12, %s987_s12   ;;  %s690_s11 = sphi %s732_s11, %s986_s11   ;;  %s686_s10 = sphi %s730_s10, %s985_s10   ;;  %s682_s9 = sphi %s728_s9, %s984_s9  }
   0x8   : > { %p74_p0 = scmp.ne.s32.totalorder %s686_s10, %s682_s9  ;;  %p762_p1 = scmp.eq.s32.totalorder %s455_s15, 0 }
   0x9   : > { %p766_p2 = scmp.eq.s32.totalorder %s455_s15, 1  ;;  %p106_p3 = scmp.eq.s32.totalorder %s456_s16, 1 }
   0xa   : > { %s968_s17 = scalar_select %p762_p1, 1, 0 }
   0xb   : > { %s969_s18 = scalar_select %p766_p2, 1, 0 }
   0xc   : > { %p772_p4 = por %p762_p1, %p74_p0  ;;  %p457_p5 = scmp.ge.s32.totalorder %s702_s14, 1 }
   0xd   : > { %p777_p6 = por %p106_p3, %p74_p0  ;;  %p113_p7 = scmp.lt.s32.totalorder %s702_s14, 3 }
   0xe   : > { %s970_s19 = scalar_select %p772_p4, 1, 0 }
   0xf   : > { %s971_s20 = scalar_select %p777_p6, 1, 0 }
  0x10   : > { %p782_p8 = pnand %p457_p5, %p113_p7  ;;  %s704_s22 = smov [#allocation2]  }
  0x11   : > { %s126_s23 = sshll.u32 %s704_s22, 4  ;;  %s31_s25 = sadd.s32 1, %s698_s13  ;;  %s127_s23 = int_to_ptr.vmem [resolvable:$true] %s126_s23 }
  0x12   : > { %s972_s21 = scalar_select %p782_p8, 1, 0 }
  0x13   : > { %p482_p10 = pneg %p782_p8  ;;  %s61_s26 = sadd.s32 1, %s690_s11 }
  0x14   : > { %p797_p12 = scmp.ge.s32.totalorder %s31_s25, 2  ;;  %s558_s30 = scalar_lea.hbm %s961_s0, 64 }
  0x15   : > { %p791_p11 = pnand %p482_p10, %p762_p1  ;;  %p559_p13 = scmp.ne.s32.totalorder %s961_s0, %s558_s30 }
  0x16   : > { %s974_s27 = scalar_select %p797_p12, 1, 0 }
  0x17   : > { %p560_p0 = pneg %p791_p11  ;;  %p565_p7 = scmp.lt.u32.totalorder %s558_s30, %s961_s0 }
  0x19   : > { %p561_p3 = pnand %p560_p0, %p559_p13 }
  0x1b   : > { %p562_p5 = pneg %p561_p3 }
  0x1d   : > { %p567_p10 = pnand %p565_p7, %p562_p5 }
  0x1f   : > { %570 = shalt.err (!%p567_p10)
}
  0x20   : > { %s571_s7 = scalar_lea.vmem %s127_s23, 64  ;;  %p579_p1 = scmp.lt.s32.totalorder %s127_s23, %s127_s23 }
  0x21   : > { %p572_p9 = scmp.ne.s32.totalorder %s127_s23, %s571_s7  ;;  %p580_p8 = scmp.lt.s32.totalorder %s571_s7, %s571_s7 }
  0x23   : > { %p574_p6 = pnand %p572_p9, %p560_p0  ;;  %p581_p2 = por %p580_p8, %p579_p1 }
  0x25   : > { %p575_p4 = pneg %p574_p6 }
  0x27   : > { %p582_p12 = pnand %p581_p2, %p575_p4 }
  0x29   : > { %585 = shalt.err (!%p582_p12)
}
  0x2a   : > { %485 = dma.hbm_to_vmem [thread:$0]  (!%p791_p11), %s961_s0, 64, %s127_s23, [#allocation3]  }
  0x2b   : > { %p975_p1 = scmp.ne.s32.totalorder %s974_s27, 0  ;;  %p68_p2 = scmp.ne.s32.totalorder %s690_s11, %s686_s10 }
  0x2c   : > { %p69_p4 = scmp.eq.s32.totalorder %s702_s14, 0  ;;  %p495_p6 = scmp.lt.s32.totalorder %s702_s14, 2 }
  0x2d   : > { %s990_s25 = smov (%p975_p1, %s31_s25), 0  ;;  %p976_p12 = scmp.ne.s32.totalorder %s969_s18, 0 }
  0x2e   : > { %s56_s16 = ssub.s32 %s698_s13, %s990_s25  ;;  %p70_p9 = por %p69_p4, %p68_p2 }
  0x2f   : > { %p59_p8 = scmp.eq.s32.totalorder %s56_s16, 0  ;;  %p829_p13 = por %p976_p12, %p68_p2 }
  0x30   : > { %s137_s24 = sand.u32 1, %s690_s11   ;;  %s471_s27 = sshll.u32 %s698_s13, 7 }
  0x31   : > { %s837_s28 = scalar_select %p59_p8, %s690_s11, %s61_s26  }
  0x32   : > { %s460_s23 = sshll.u32 %s137_s24, 3  ;;  %s843_s3 = scalar_lea.hbm %s962_s1, %s471_s27 }
  0x33   : > { %s141_s18 = scalar_lea.vmem [#allocation5], %s460_s23  ;;  %p847_p11 = pnand %p495_p6, %p70_p9 }
  0x34   : > { %s151_s4 = sshll.u32 %s141_s18, 4  ;;  %s138_s26 = scalar_lea.sflag [#allocation6], %s137_s24  ;;  %s845_s4 = int_to_ptr.vmem [resolvable:$true] %s151_s4 }
  0x35   : > { %s586_s6 = scalar_lea.hbm %s843_s3, 128  ;;  %p588_p3 = pneg %p847_p11 }
  0x36   : > { %p587_p0 = scmp.ne.s32.totalorder %s843_s3, %s586_s6  ;;  %s591_s15 = scalar_lea.hbm %s962_s1, 256 }
  0x37   : > { %p592_p10 = scmp.lt.u32.totalorder %s843_s3, %s962_s1  ;;  %p593_p1 = scmp.lt.u32.totalorder %s591_s15, %s586_s6 }
  0x38   : > { %p589_p5 = pnand %p588_p3, %p587_p0  ;;  %p595_p4 = scmp.lt.u32.totalorder %s586_s6, %s843_s3 }
  0x39   : > { %p594_p2 = por %p593_p1, %p592_p10 }
  0x3a   : > { %p590_p7 = pneg %p589_p5 }
  0x3b   : > { %p596_p6 = por %p595_p4, %p594_p2 }
  0x3d   : > { %p597_p8 = pnand %p596_p6, %p590_p7 }
  0x3f   : > { %600 = shalt.err (!%p597_p8)
}
  0x40   : > { %s601_s24 = scalar_lea.vmem %s845_s4, 128  ;;  %s705_s27 = smov [#allocation5]  }
  0x41   : > { %p602_p9 = scmp.ne.s32.totalorder %s845_s4, %s601_s24  ;;  %s606_s29 = sshll.u32 %s705_s27, 4  ;;  %s607_s29 = int_to_ptr.vmem [resolvable:$false] %s606_s29 }
  0x42   : > { %s608_s30 = scalar_lea.vmem %s607_s29, 256  ;;  %p609_p5 = scmp.lt.s32.totalorder %s845_s4, %s607_s29 }
  0x43   : > { %p604_p12 = pnand %p602_p9, %p588_p3  ;;  %p610_p10 = scmp.lt.s32.totalorder %s608_s30, %s601_s24 }
  0x45   : > { %p605_p0 = pneg %p604_p12  ;;  %p611_p1 = por %p610_p10, %p609_p5 }
  0x47   : > { %p612_p2 = pnand %p611_p1, %p605_p0 }
  0x49   : > { %615 = shalt.err (!%p612_p2)
}
  0x4a   : > { %489 = dma.hbm_to_vmem [thread:$0]  (!%p847_p11), %s843_s3, 128, %s845_s4, %s138_s26  }
  0x4b   : > { %p979_p7 = scmp.ne.s32.totalorder %s972_s21, 0 }
  0x4c   : > { %p980_p3 = scmp.ne.s32.totalorder (!%p979_p7), %s968_s17, 0 }
  0x4d   : > { %160 = sbr.rel (%p979_p7) target bundleno = 383 (0x17f), region = 28 }
  0x54   : > { %669 = dma.done.wait (%p980_p3), [#allocation3], 64  }
  0x55   : > { %671 = vsyncadd (%p980_p3), [#allocation3], 4294967232  ;;  %s883_s18 = sand.u32 1, %s686_s10   ;;  %p981_p4 = scmp.ne.s32.totalorder %s970_s19, 0 }
  0x56   : > { %s465_s6 = sshll.u32 %s883_s18, 3  ;;  %s167_s5 = scalar_lea.sflag [#allocation6], %s883_s18 }
  0x57   : > { %s170_s7 = scalar_lea.vmem [#allocation5], %s465_s6 }
  0x58   : > { %673 = dma.done.wait (%p981_p4), %s167_s5, 128  }
  0x59   : > { %675 = vsyncadd (%p981_p4), %s167_s5, 4294967168  ;;  %v191_v0 = vld [vmem:[%s170_s7] sm:$0xff]  ;;  %s706_s21 = smov 112   ;;  %s707_s3 = smov 16   ;;  %vm201_vm0 = vcmask 130048   ;;  %vm210_vm1 = vcmask 916480   ;;  %v237_v18 = vlaneseq }
  0x5a   : > { %206 = vrot.lane.b32.xlu1 %v191_v0, %s706_s21  ;;  %197 = vrot.lane.b32.xlu0 %v191_v0, %s707_s3  ;;  %v196_v1 = vcombine.high %v191_v0, %v191_v0  ;;  %v217_v4 = vmul.f32 2.0, %v191_v0  ;;  %s708_s17 = smov 1   ;;  %s709_s19 = smov 127   ;;  %v192_v22 = vld [vmem:[#allocation2] ss:$2 sm:$0x3] }
  0x5b   : > { %v238_v19 = vshrl.u32 %v237_v18, 7  ;;  %vm231_vm2 = vcmask 7168   ;;  %v194_v25 = vld [vmem:[#allocation2 + $0x1] ss:$2 sm:$0x3]  ;;  %vm253_vm3 = vcmask 1039360  }
  0x5c   : > { %v219_v12 = vcombine.high %v217_v4, %v217_v4  ;;  %s472_s4 = smul.u32 24, %s883_s18  ;;  %s341_s24 = scalar_lea.sflag [#allocation4], %s883_s18 }
  0x5d   : > { %v239_v20 = vsub.s32 0, %v238_v19  ;;  %v243_v21 = vsub.s32 1, %v238_v19  ;;  %s473_s15 = smul.u32 384, %s694_s12  ;;  %s710_s29 = smov [#allocation7]  }
  0x5e   : > { %208 = vrot.lane.b32.xlu1 %v196_v1, %s706_s21  ;;  %199 = vrot.lane.b32.xlu0 %v196_v1, %s707_s3  ;;  %s898_s26 = scalar_lea.vmem [#allocation7], %s472_s4  ;;  %s620_s30 = sshll.u32 %s710_s29, 4  ;;  %s621_s30 = int_to_ptr.vmem [resolvable:$false] %s620_s30 }
  0x5f   : > { %v240_v23 = vrot.slane %v192_v22, %v239_v20  ;;  %v244_v24 = vrot.slane %v192_v22, %v243_v21  ;;  %v266_v32 = vrot.slane %v194_v25, %v243_v21  ;;  %v262_v33 = vrot.slane %v194_v25, %v239_v20  ;;  %s356_s8 = sshll.u32 %s898_s26, 4  ;;  %s911_s23 = scalar_lea.hbm %s963_s2, %s473_s15  ;;  %s906_s8 = int_to_ptr.vmem [resolvable:$true] %s356_s8 }
  0x60   : > { %s616_s27 = scalar_lea.vmem %s906_s8, 384  ;;  %s622_s6 = scalar_lea.vmem %s621_s30, 768 }
  0x61   : > { %p617_p11 = scmp.ne.s32.totalorder %s906_s8, %s616_s27  ;;  %p623_p9 = scmp.lt.s32.totalorder %s906_s8, %s621_s30 }
  0x62   : > { %p624_p12 = scmp.lt.s32.totalorder %s622_s6, %s616_s27 }
  0x63   : > { %p618_p6 = pnand %p617_p11, %p829_p13 }
  0x64   : > { %p625_p0 = por %p624_p12, %p623_p9 }
  0x65   : > { %p619_p8 = pneg %p618_p6 }
  0x67   : > { %p626_p5 = pnand %p625_p0, %p619_p8 }
  0xcc   : > { %v207_v2 = vpop.permute.xlu1 %206  ;;  %v198_v3 = vpop.permute.xlu0 %197 }
  0xcd   : > { %v205_v7 = vsel %vm201_vm0, 0.0, %v198_v3 }
  0xce   : > { %v221_v15 = vadd.f32 %v217_v4, %v205_v7 }
  0xd0   : > { %v209_v5 = vpop.permute.xlu1 %208  ;;  %v200_v6 = vpop.permute.xlu0 %199 }
  0xd1   : > { %v211_v8 = vsel %vm210_vm1, %v207_v2, %v209_v5  ;;  %v214_v9 = vsel %vm210_vm1, %v209_v5, 0.0  ;;  %v202_v10 = vsel %vm201_vm0, %v198_v3, %v200_v6 }
  0xd2   : > { %v215_v11 = vsub.f32 %v211_v8, %v205_v7  ;;  %v216_v13 = vsub.f32 %v214_v9, %v202_v10  ;;  %v222_v14 = vadd.f32 %v219_v12, %v202_v10  ;;  %v223_v16 = vadd.f32 %v221_v15, %v211_v8 }
  0xd4   : > { %227 = vrot.lane.b32.xlu0 %v215_v11, %s708_s17  ;;  %229 = vrot.lane.b32.xlu1 %v216_v13, %s708_s17  ;;  %v224_v17 = vadd.f32 %v222_v14, %v214_v9  ;;  %v293_v34 = vmul.f32 2.0, %v215_v11  ;;  %v294_v35 = vmul.f32 2.0, %v216_v13 }
  0xd8   : > { %249 = vrot.lane.b32.xlu0 %v215_v11, %s709_s19  ;;  %251 = vrot.lane.b32.xlu1 %v216_v13, %s709_s19 }
  0xdc   : > { %273 = vrot.lane.b32.xlu0 %v223_v16, %s708_s17  ;;  %275 = vrot.lane.b32.xlu1 %v224_v17, %s708_s17 }
  0xe0   : > { %283 = vrot.lane.b32.xlu0 %v223_v16, %s709_s19  ;;  %285 = vrot.lane.b32.xlu1 %v224_v17, %s709_s19 }
 0x146   : > { %v230_v26 = vpop.permute.xlu1 %229  ;;  %v228_v27 = vpop.permute.xlu0 %227 }
 0x147   : > { %v232_v28 = vsel %vm231_vm2, %v228_v27, %v230_v26  ;;  %v235_v29 = vsel %vm231_vm2, 0.0, %v228_v27 }
 0x148   : > { %v247_v30 = vmul.f32 %v240_v23, %v235_v29  ;;  %v248_v31 = vmul.f32 %v244_v24, %v232_v28 }
 0x14a   : > { %v252_v36 = vpop.permute.xlu1 %251  ;;  %v250_v37 = vpop.permute.xlu0 %249  ;;  %v295_v40 = vadd.f32 %v293_v34, %v247_v30  ;;  %v296_v41 = vadd.f32 %v294_v35, %v248_v31 }
 0x14b   : > { %v257_v38 = vsel %vm253_vm3, %v252_v36, 0.0  ;;  %v254_v39 = vsel %vm253_vm3, %v250_v37, %v252_v36 }
 0x14c   : > { %v270_v42 = vmul.f32 %v266_v32, %v257_v38  ;;  %v269_v43 = vmul.f32 %v262_v33, %v254_v39 }
 0x14e   : > { %v298_v44 = vadd.f32 %v296_v41, %v270_v42  ;;  %v297_v45 = vadd.f32 %v295_v40, %v269_v43  ;;  %v276_v46 = vpop.permute.xlu1 %275  ;;  %v274_v47 = vpop.permute.xlu0 %273 }
 0x14f   : > { %v277_v49 = vsel %vm231_vm2, %v274_v47, %v276_v46  ;;  %v280_v50 = vsel %vm231_vm2, 0.0, %v274_v47 }
 0x150   : > { %v336_v48 = vcombine.low %v297_v45, %v298_v44  ;;  %v281_v55 = vmul.f32 %v280_v50, %v240_v23  ;;  %v282_v56 = vmul.f32 %v277_v49, %v244_v24  ;;  %v302_v61 = vmul.f32 %v298_v44, %v298_v44 }
 0x151   : > { %v301_v62 = vmul.f32 %v297_v45, %v297_v45 }
 0x152   : > { %467 = vst [vmem:[%s898_s26 + $0x10] sm:$0xff] %v336_v48  ;;  %v286_v51 = vpop.permute.xlu1 %285  ;;  %v284_v52 = vpop.permute.xlu0 %283 }
 0x153   : > { %v290_v53 = vsel %vm253_vm3, %v286_v51, 0.0  ;;  %v287_v54 = vsel %vm253_vm3, %v284_v52, %v286_v51 }
 0x154   : > { %v292_v57 = vmul.f32 %v290_v53, %v266_v32  ;;  %v291_v58 = vmul.f32 %v287_v54, %v262_v33 }
 0x156   : > { %v300_v59 = vsub.f32 %v292_v57, %v282_v56  ;;  %v299_v60 = vsub.f32 %v291_v58, %v281_v55 }
 0x158   : > { %v304_v63 = vmul.f32 %v300_v59, %v300_v59  ;;  %v303_v0 = vmul.f32 %v299_v60, %v299_v60  ;;  %v330_v1 = vcombine.low %v299_v60, %v300_v59 }
 0x15a   : > { %v306_v2 = vadd.f32 %v304_v63, %v302_v61  ;;  %v305_v3 = vadd.f32 %v303_v0, %v301_v62  ;;  %466 = vst [vmem:[%s898_s26 + $0x8] sm:$0xff] %v330_v1 }
 0x15c   : > { %v308_v4 = vadd.f32 1e-06, %v306_v2  ;;  %v307_v5 = vadd.f32 1e-06, %v305_v3 }
 0x15e   : > { %554 = vrsqrt.f32 %v308_v4  ;;  %vm318_vm4 = vcmp.eq.f32.partialorder %v308_v4, inf  ;;  %v321_v9 = vand.u32 2147483648, %v308_v4  ;;  %vm320_vm5 = vcmp.eq.f32.partialorder %v308_v4, 0.0 }
 0x15f   : > { %556 = vrsqrt.f32 %v307_v5  ;;  %vm311_vm6 = vcmp.eq.f32.partialorder %v307_v5, inf  ;;  %v314_v12 = vand.u32 2147483648, %v307_v5  ;;  %vm313_vm7 = vcmp.eq.f32.partialorder %v307_v5, 0.0 }
 0x168   : > { %v555_v6 = vpop.eup %554 }
 0x169   : > { %v557_v7 = vpop.eup %556  ;;  %v317_v8 = vmul.f32 %v555_v6, %v308_v4 }
 0x16a   : > { %v310_v10 = vmul.f32 %v557_v7, %v307_v5 }
 0x16b   : > { %v319_v11 = vsel %vm318_vm4, %v308_v4, %v317_v8 }
 0x16c   : > { %v312_v13 = vsel %vm311_vm6, %v307_v5, %v310_v10  ;;  %v322_v14 = vsel %vm320_vm5, %v321_v9, %v319_v11 }
 0x16d   : > { %v315_v15 = vsel %vm313_vm7, %v314_v12, %v312_v13 }
 0x16e   : > { %v325_v16 = vcombine.low %v315_v15, %v322_v14 }
 0x170   : > { %327 = vst [vmem:[%s898_s26] sm:$0xff] %v325_v16 }
 0x171   : > { %629 = shalt.err (!%p626_p5)
}
 0x172   : > { %s630_s5 = scalar_lea.hbm %s911_s23, 384  ;;  %s634_s3 = scalar_lea.hbm %s963_s2, 768 }
 0x173   : > { %p631_p10 = scmp.ne.s32.totalorder %s911_s23, %s630_s5  ;;  %p635_p7 = scmp.lt.u32.totalorder %s911_s23, %s963_s2 }
 0x174   : > { %p636_p3 = scmp.lt.u32.totalorder %s634_s3, %s630_s5  ;;  %p638_p11 = scmp.lt.u32.totalorder %s630_s5, %s911_s23 }
 0x175   : > { %p632_p1 = pnand %p631_p10, %p829_p13 }
 0x176   : > { %p637_p4 = por %p636_p3, %p635_p7 }
 0x177   : > { %p633_p2 = pneg %p632_p1 }
 0x178   : > { %p639_p6 = por %p638_p11, %p637_p4 }
 0x17a   : > { %p640_p8 = pnand %p639_p6, %p633_p2 }
 0x17c   : > { %643 = shalt.err (!%p640_p8)
}
 0x17d   : > { %s711_s4 = smov 128   ;;  %s712_s26 = smov 8  }
 0x17e   : > { %480 = dma.vmem_to_hbm [thread:$0]  (%p829_p13), %s906_s8, 384, %s911_s23, %s341_s24, %s711_s4, %s711_s4, %s712_s26  }
 0x17f PF: > { %s371_s15 = sand.u32 1, %s682_s9   ;;  %p982_p9 = scmp.ne.s32.totalorder %s971_s20, 0 }
 0x180   : > { %p983_p12 = scmp.ge.s32.totalorder %s702_s14, 2  ;;  %s372_s16 = scalar_lea.sflag [#allocation4], %s371_s15 }
 0x182   : > { %p491_p0 = pnand %p983_p12, %p982_p9 }
 0x184   : > { %677 = dma.done.wait (!%p491_p0), %s372_s16, 384  }
 0x185   : > { %679 = vsyncadd (!%p491_p0), %s372_s16, 4294966912  ;;  %s19_s14 = sadd.s32 1, %s702_s14   ;;  %s984_s9 = smov %s686_s10 }
 0x186   : > { %p16_p5 = scmp.ge.s32.totalorder %s19_s14, 4   ;;  %s985_s10 = smov %s690_s11 }
 0x187   : > { %s986_s11 = smov %s837_s28  ;;  %s987_s12 = smov %s698_s13 }
 0x188   : > { %s988_s13 = smov %s990_s25  ;;  %18 = sbr.rel (!%p16_p5) target bundleno = 7 (0x7), region = 81 }
 0x18f   :  { %377 = vsyncpa [#allocation3], 1 }
 0x190   :  { %379 = vsyncpa [#allocation3 + $0x1], 1 }
 0x191   :  { %380 = vsyncpa [#allocation6], 1 }
 0x192   :  { %382 = vsyncpa [#allocation6 + $0x1], 1 }
 0x193   :  { %383 = vsyncpa [#allocation4], 1 }
 0x194   :  { %385 = vsyncpa [#allocation4 + $0x1], 1 }

</bundles_post_ra>
